<compile_context>
chip_gen: v5e
topology: v5e:2x2
jax: 0.10.0
libtpu: 0.0.40
codegen_flags: <defaults>
</compile_context>

<pallas_src>
import functools

import jax
import jax.numpy as jnp
from jax.experimental import pallas as pl
from jax.experimental.pallas import tpu as pltpu


def _slice_kernel(Cg, D, g_ref, st_ref, guide_ref, o_ref):
    # g_ref:     (1, D, Cg, Hg*Wg)  bilateral grid for this batch (depth-major rows)
    # st_ref:    (Hg*Wg, H*W)       fixed spatial (x, y) resampling matrix S^T
    # guide_ref: (1, 1, H*W)        guide plane, pixels on lanes
    # o_ref:     (1, Cg, H*W)       sliced coefficients
    z = (guide_ref[0].astype(jnp.float32) + 1.0) * (0.5 * (D - 1))      # (1, P)
    st = st_ref[...].astype(jnp.float32)                                # (GP, P)
    acc = jnp.zeros(o_ref.shape[1:], jnp.float32)                       # (Cg, P)
    for d in range(D):  # D is small and static: fully unrolled
        # Fixed spatial bilinear resample of depth slice d on the MXU.
        u_d = jnp.dot(g_ref[0, d].astype(jnp.float32), st,
                      preferred_element_type=jnp.float32)               # (Cg, P)
        # Guide-dependent trilinear hat weight along depth (== zeros padding).
        w_d = jnp.maximum(0.0, 1.0 - jnp.abs(z - float(d)))             # (1, P)
        acc = acc + w_d * u_d
    o_ref[0] = acc.astype(o_ref.dtype)


def slice_op(grid, guide):
    """Pallas TPU implementation of Slice.forward.

    grid:  (B, Cg, D, Hg, Wg) bilateral grid.
    guide: (B, 1, H, W)       guide map (z sampling coordinate in [-1, 1]).
    Returns (B, Cg, H, W).
    """
    B, Cg, D, Hg, Wg = grid.shape
    Bg, C, H, W = guide.shape
    assert Bg == B and C == 1, "Slice expects a single-channel guide"
    P = H * W
    GP = Hg * Wg
    f32 = jnp.float32

    # Data-independent spatial resampling weights (align_corners=True): output
    # pixel (h, w) samples grid position (h*(Hg-1)/(H-1), w*(Wg-1)/(W-1));
    # bilinear interpolation == separable hat-function weights.
    yc = jnp.arange(H, dtype=f32) * (float(Hg - 1) / float(H - 1))
    xc = jnp.arange(W, dtype=f32) * (float(Wg - 1) / float(W - 1))
    sy = jnp.maximum(0.0, 1.0 - jnp.abs(yc[:, None] - jnp.arange(Hg, dtype=f32)[None, :]))
    sx = jnp.maximum(0.0, 1.0 - jnp.abs(xc[:, None] - jnp.arange(Wg, dtype=f32)[None, :]))
    s_t = (sy[:, None, :, None] * sx[None, :, None, :]).reshape(P, GP).T    # (GP, P)

    # Depth-major, spatially flattened layouts; one batch per grid step.
    grid_r = jnp.transpose(grid.reshape(B, Cg, D, GP), (0, 2, 1, 3))        # (B, D, Cg, GP)
    guide_r = guide.reshape(B, 1, P)

    kern = functools.partial(_slice_kernel, Cg, D)
    out = pl.pallas_call(
        kern,
        out_shape=jax.ShapeDtypeStruct((B, Cg, P), grid.dtype),
        grid=(B,),
        in_specs=[
            pl.BlockSpec((1, D, Cg, GP), lambda b: (b, 0, 0, 0)),   # bilateral grid
            pl.BlockSpec((GP, P), lambda b: (0, 0)),                # S^T (shared, tiny)
            pl.BlockSpec((1, 1, P), lambda b: (b, 0, 0)),           # guide plane
        ],
        out_specs=pl.BlockSpec((1, Cg, P), lambda b: (b, 0, 0)),
        compiler_params=pltpu.CompilerParams(
            dimension_semantics=("parallel",)),
    )(grid_r, s_t, guide_r)
    return out.reshape(B, Cg, H, W)


def _reference(grid, guide):
    """Pure-JAX reference of Slice.forward: explicit 8-corner trilinear
    grid_sample with align_corners=True and zeros padding (independent of the
    hat-weight formulation used in the kernel)."""
    B, Cg, D, Hg, Wg = grid.shape
    _, _, H, W = guide.shape
    f32 = jnp.float32
    ys = jnp.arange(H, dtype=f32) * (2.0 / (H - 1)) - 1.0
    xs = jnp.arange(W, dtype=f32) * (2.0 / (W - 1)) - 1.0
    yy, xx = jnp.meshgrid(ys, xs, indexing="ij")
    ix = jnp.broadcast_to((xx + 1.0) * 0.5 * (Wg - 1), (B, H, W))
    iy = jnp.broadcast_to((yy + 1.0) * 0.5 * (Hg - 1), (B, H, W))
    iz = (guide[:, 0].astype(f32) + 1.0) * 0.5 * (D - 1)

    x0 = jnp.floor(ix); x1 = x0 + 1.0
    y0 = jnp.floor(iy); y1 = y0 + 1.0
    z0 = jnp.floor(iz); z1 = z0 + 1.0

    gridf = grid.astype(f32)
    out = jnp.zeros((B, Cg, H, W), f32)
    for zi, wz in ((z0, z1 - iz), (z1, iz - z0)):
        for yi, wy in ((y0, y1 - iy), (y1, iy - y0)):
            for xi, wx in ((x0, x1 - ix), (x1, ix - x0)):
                valid = ((zi >= 0) & (zi <= D - 1)
                         & (yi >= 0) & (yi <= Hg - 1)
                         & (xi >= 0) & (xi <= Wg - 1))
                w = jnp.where(valid, wz * wy * wx, 0.0)
                zc = jnp.clip(zi, 0, D - 1).astype(jnp.int32)
                yc = jnp.clip(yi, 0, Hg - 1).astype(jnp.int32)
                xc = jnp.clip(xi, 0, Wg - 1).astype(jnp.int32)
                vals = jax.vmap(lambda g, a, b, c: g[:, a, b, c])(gridf, zc, yc, xc)
                out = out + w[:, None] * vals
    return out.astype(grid.dtype)


if __name__ == "__main__":
    key = jax.random.PRNGKey(0)
    k1, k2 = jax.random.split(key)

    # Small HDRNet-like shapes: 12 affine coeffs, 8 depth bins, 9x9 spatial grid,
    # 17x17 guide. The 2:1 guide->grid ratio makes the spatial weights exactly
    # representable, so the check is insensitive to MXU matmul precision.
    B, Cg, D, Hg, Wg = 2, 12, 8, 9, 9
    H = W = 17

    grid = jax.random.normal(k1, (B, Cg, D, Hg, Wg), dtype=jnp.float32)
    grid = grid.astype(jnp.bfloat16).astype(jnp.float32)      # bf16-exact values
    guide = jax.random.uniform(k2, (B, 1, H, W), dtype=jnp.float32,
                               minval=-1.1, maxval=1.1)       # also exercises zero padding

    out = slice_op(grid, guide)
    out = jax.block_until_ready(out)

    ref = _reference(grid, guide)
    assert out.shape == (B, Cg, H, W)
    assert jnp.allclose(out, ref, rtol=1e-4, atol=1e-4), "mismatch vs reference"

    print("KERNEL_OK")
</pallas_src>

<mosaic_0001>
module attributes {stable_mosaic.version = 11 : i64} {
  func.func @_slice_kernel(%arg0: i32, %arg1: memref<1x8x12x81xf32, #tpu.memory_space<vmem>>, %arg2: memref<81x289xf32, #tpu.memory_space<vmem>>, %arg3: memref<1x1x289xf32, #tpu.memory_space<vmem>>, %arg4: memref<1x12x289xf32, #tpu.memory_space<vmem>>) attributes {dimension_semantics = [#tpu.dimension_semantics<parallel>], iteration_bounds = array<i64: 2>, scalar_prefetch = 0 : i64, scratch_operands = 0 : i64, tpu.core_type = #tpu.core_type<tc>, window_params = [{transform_indices = @transform_0, window_bounds = array<i64: 1, 8, 12, 81>}, {pipeline_mode = #tpu.pipeline_mode<synchronous>, transform_indices = @transform_1, window_bounds = array<i64: 81, 289>}, {transform_indices = @transform_2, window_bounds = array<i64: 1, 1, 289>}, {transform_indices = @transform_3, window_bounds = array<i64: 1, 12, 289>}]} {
    %c0 = arith.constant 0 : index
    %c0_0 = arith.constant 0 : index
    %c0_1 = arith.constant 0 : index
    %0 = vector.load %arg3[%c0, %c0_0, %c0_1] : memref<1x1x289xf32, #tpu.memory_space<vmem>>, vector<1x1x289xf32>
    %1 = vector.shape_cast %0 : vector<1x1x289xf32> to vector<1x289xf32>
    %cst = arith.constant 1.000000e+00 : f32
    %2 = vector.broadcast %cst : f32 to vector<1x289xf32>
    %3 = arith.addf %1, %2 : vector<1x289xf32>
    %cst_2 = arith.constant 3.500000e+00 : f32
    %4 = vector.broadcast %cst_2 : f32 to vector<1x289xf32>
    %5 = arith.mulf %3, %4 : vector<1x289xf32>
    %c0_3 = arith.constant 0 : index
    %c0_4 = arith.constant 0 : index
    %6 = vector.load %arg2[%c0_3, %c0_4] : memref<81x289xf32, #tpu.memory_space<vmem>>, vector<81x289xf32>
    %cst_5 = arith.constant 0.000000e+00 : f32
    %7 = vector.broadcast %cst_5 : f32 to vector<12x289xf32>
    %c0_6 = arith.constant 0 : index
    %c0_7 = arith.constant 0 : index
    %c0_8 = arith.constant 0 : index
    %c0_9 = arith.constant 0 : index
    %8 = vector.load %arg1[%c0_6, %c0_7, %c0_8, %c0_9] : memref<1x8x12x81xf32, #tpu.memory_space<vmem>>, vector<1x1x12x81xf32>
    %9 = vector.shape_cast %8 : vector<1x1x12x81xf32> to vector<12x81xf32>
    %cst_10 = arith.constant dense<0.000000e+00> : vector<12x289xf32>
    %10 = tpu.matmul %9, %6, %cst_10 {dimension_numbers = #tpu.dot_dimension_numbers<[1], [0], [0], [1], [0, 0, 1, 1], [], []>} : vector<12x81xf32>, vector<81x289xf32>, vector<12x289xf32> -> vector<12x289xf32>
    %cst_11 = arith.constant 0.000000e+00 : f32
    %11 = vector.broadcast %cst_11 : f32 to vector<1x289xf32>
    %12 = arith.subf %5, %11 : vector<1x289xf32>
    %13 = math.absf %12 : vector<1x289xf32>
    %cst_12 = arith.constant 1.000000e+00 : f32
    %14 = vector.broadcast %cst_12 : f32 to vector<1x289xf32>
    %15 = arith.subf %14, %13 : vector<1x289xf32>
    %cst_13 = arith.constant 0.000000e+00 : f32
    %16 = vector.broadcast %cst_13 : f32 to vector<1x289xf32>
    %17 = arith.maximumf %16, %15 : vector<1x289xf32>
    %18 = vector.broadcast %17 : vector<1x289xf32> to vector<12x289xf32>
    %19 = arith.mulf %18, %10 : vector<12x289xf32>
    %20 = arith.addf %7, %19 : vector<12x289xf32>
    %c0_14 = arith.constant 0 : index
    %c1 = arith.constant 1 : index
    %c0_15 = arith.constant 0 : index
    %c0_16 = arith.constant 0 : index
    %21 = vector.load %arg1[%c0_14, %c1, %c0_15, %c0_16] : memref<1x8x12x81xf32, #tpu.memory_space<vmem>>, vector<1x1x12x81xf32>
    %22 = vector.shape_cast %21 : vector<1x1x12x81xf32> to vector<12x81xf32>
    %cst_17 = arith.constant dense<0.000000e+00> : vector<12x289xf32>
    %23 = tpu.matmul %22, %6, %cst_17 {dimension_numbers = #tpu.dot_dimension_numbers<[1], [0], [0], [1], [0, 0, 1, 1], [], []>} : vector<12x81xf32>, vector<81x289xf32>, vector<12x289xf32> -> vector<12x289xf32>
    %cst_18 = arith.constant 1.000000e+00 : f32
    %24 = vector.broadcast %cst_18 : f32 to vector<1x289xf32>
    %25 = arith.subf %5, %24 : vector<1x289xf32>
    %26 = math.absf %25 : vector<1x289xf32>
    %cst_19 = arith.constant 1.000000e+00 : f32
    %27 = vector.broadcast %cst_19 : f32 to vector<1x289xf32>
    %28 = arith.subf %27, %26 : vector<1x289xf32>
    %cst_20 = arith.constant 0.000000e+00 : f32
    %29 = vector.broadcast %cst_20 : f32 to vector<1x289xf32>
    %30 = arith.maximumf %29, %28 : vector<1x289xf32>
    %31 = vector.broadcast %30 : vector<1x289xf32> to vector<12x289xf32>
    %32 = arith.mulf %31, %23 : vector<12x289xf32>
    %33 = arith.addf %20, %32 : vector<12x289xf32>
    %c0_21 = arith.constant 0 : index
    %c2 = arith.constant 2 : index
    %c0_22 = arith.constant 0 : index
    %c0_23 = arith.constant 0 : index
    %34 = vector.load %arg1[%c0_21, %c2, %c0_22, %c0_23] : memref<1x8x12x81xf32, #tpu.memory_space<vmem>>, vector<1x1x12x81xf32>
    %35 = vector.shape_cast %34 : vector<1x1x12x81xf32> to vector<12x81xf32>
    %cst_24 = arith.constant dense<0.000000e+00> : vector<12x289xf32>
    %36 = tpu.matmul %35, %6, %cst_24 {dimension_numbers = #tpu.dot_dimension_numbers<[1], [0], [0], [1], [0, 0, 1, 1], [], []>} : vector<12x81xf32>, vector<81x289xf32>, vector<12x289xf32> -> vector<12x289xf32>
    %cst_25 = arith.constant 2.000000e+00 : f32
    %37 = vector.broadcast %cst_25 : f32 to vector<1x289xf32>
    %38 = arith.subf %5, %37 : vector<1x289xf32>
    %39 = math.absf %38 : vector<1x289xf32>
    %cst_26 = arith.constant 1.000000e+00 : f32
    %40 = vector.broadcast %cst_26 : f32 to vector<1x289xf32>
    %41 = arith.subf %40, %39 : vector<1x289xf32>
    %cst_27 = arith.constant 0.000000e+00 : f32
    %42 = vector.broadcast %cst_27 : f32 to vector<1x289xf32>
    %43 = arith.maximumf %42, %41 : vector<1x289xf32>
    %44 = vector.broadcast %43 : vector<1x289xf32> to vector<12x289xf32>
    %45 = arith.mulf %44, %36 : vector<12x289xf32>
    %46 = arith.addf %33, %45 : vector<12x289xf32>
    %c0_28 = arith.constant 0 : index
    %c3 = arith.constant 3 : index
    %c0_29 = arith.constant 0 : index
    %c0_30 = arith.constant 0 : index
    %47 = vector.load %arg1[%c0_28, %c3, %c0_29, %c0_30] : memref<1x8x12x81xf32, #tpu.memory_space<vmem>>, vector<1x1x12x81xf32>
    %48 = vector.shape_cast %47 : vector<1x1x12x81xf32> to vector<12x81xf32>
    %cst_31 = arith.constant dense<0.000000e+00> : vector<12x289xf32>
    %49 = tpu.matmul %48, %6, %cst_31 {dimension_numbers = #tpu.dot_dimension_numbers<[1], [0], [0], [1], [0, 0, 1, 1], [], []>} : vector<12x81xf32>, vector<81x289xf32>, vector<12x289xf32> -> vector<12x289xf32>
    %cst_32 = arith.constant 3.000000e+00 : f32
    %50 = vector.broadcast %cst_32 : f32 to vector<1x289xf32>
    %51 = arith.subf %5, %50 : vector<1x289xf32>
    %52 = math.absf %51 : vector<1x289xf32>
    %cst_33 = arith.constant 1.000000e+00 : f32
    %53 = vector.broadcast %cst_33 : f32 to vector<1x289xf32>
    %54 = arith.subf %53, %52 : vector<1x289xf32>
    %cst_34 = arith.constant 0.000000e+00 : f32
    %55 = vector.broadcast %cst_34 : f32 to vector<1x289xf32>
    %56 = arith.maximumf %55, %54 : vector<1x289xf32>
    %57 = vector.broadcast %56 : vector<1x289xf32> to vector<12x289xf32>
    %58 = arith.mulf %57, %49 : vector<12x289xf32>
    %59 = arith.addf %46, %58 : vector<12x289xf32>
    %c0_35 = arith.constant 0 : index
    %c4 = arith.constant 4 : index
    %c0_36 = arith.constant 0 : index
    %c0_37 = arith.constant 0 : index
    %60 = vector.load %arg1[%c0_35, %c4, %c0_36, %c0_37] : memref<1x8x12x81xf32, #tpu.memory_space<vmem>>, vector<1x1x12x81xf32>
    %61 = vector.shape_cast %60 : vector<1x1x12x81xf32> to vector<12x81xf32>
    %cst_38 = arith.constant dense<0.000000e+00> : vector<12x289xf32>
    %62 = tpu.matmul %61, %6, %cst_38 {dimension_numbers = #tpu.dot_dimension_numbers<[1], [0], [0], [1], [0, 0, 1, 1], [], []>} : vector<12x81xf32>, vector<81x289xf32>, vector<12x289xf32> -> vector<12x289xf32>
    %cst_39 = arith.constant 4.000000e+00 : f32
    %63 = vector.broadcast %cst_39 : f32 to vector<1x289xf32>
    %64 = arith.subf %5, %63 : vector<1x289xf32>
    %65 = math.absf %64 : vector<1x289xf32>
    %cst_40 = arith.constant 1.000000e+00 : f32
    %66 = vector.broadcast %cst_40 : f32 to vector<1x289xf32>
    %67 = arith.subf %66, %65 : vector<1x289xf32>
    %cst_41 = arith.constant 0.000000e+00 : f32
    %68 = vector.broadcast %cst_41 : f32 to vector<1x289xf32>
    %69 = arith.maximumf %68, %67 : vector<1x289xf32>
    %70 = vector.broadcast %69 : vector<1x289xf32> to vector<12x289xf32>
    %71 = arith.mulf %70, %62 : vector<12x289xf32>
    %72 = arith.addf %59, %71 : vector<12x289xf32>
    %c0_42 = arith.constant 0 : index
    %c5 = arith.constant 5 : index
    %c0_43 = arith.constant 0 : index
    %c0_44 = arith.constant 0 : index
    %73 = vector.load %arg1[%c0_42, %c5, %c0_43, %c0_44] : memref<1x8x12x81xf32, #tpu.memory_space<vmem>>, vector<1x1x12x81xf32>
    %74 = vector.shape_cast %73 : vector<1x1x12x81xf32> to vector<12x81xf32>
    %cst_45 = arith.constant dense<0.000000e+00> : vector<12x289xf32>
    %75 = tpu.matmul %74, %6, %cst_45 {dimension_numbers = #tpu.dot_dimension_numbers<[1], [0], [0], [1], [0, 0, 1, 1], [], []>} : vector<12x81xf32>, vector<81x289xf32>, vector<12x289xf32> -> vector<12x289xf32>
    %cst_46 = arith.constant 5.000000e+00 : f32
    %76 = vector.broadcast %cst_46 : f32 to vector<1x289xf32>
    %77 = arith.subf %5, %76 : vector<1x289xf32>
    %78 = math.absf %77 : vector<1x289xf32>
    %cst_47 = arith.constant 1.000000e+00 : f32
    %79 = vector.broadcast %cst_47 : f32 to vector<1x289xf32>
    %80 = arith.subf %79, %78 : vector<1x289xf32>
    %cst_48 = arith.constant 0.000000e+00 : f32
    %81 = vector.broadcast %cst_48 : f32 to vector<1x289xf32>
    %82 = arith.maximumf %81, %80 : vector<1x289xf32>
    %83 = vector.broadcast %82 : vector<1x289xf32> to vector<12x289xf32>
    %84 = arith.mulf %83, %75 : vector<12x289xf32>
    %85 = arith.addf %72, %84 : vector<12x289xf32>
    %c0_49 = arith.constant 0 : index
    %c6 = arith.constant 6 : index
    %c0_50 = arith.constant 0 : index
    %c0_51 = arith.constant 0 : index
    %86 = vector.load %arg1[%c0_49, %c6, %c0_50, %c0_51] : memref<1x8x12x81xf32, #tpu.memory_space<vmem>>, vector<1x1x12x81xf32>
    %87 = vector.shape_cast %86 : vector<1x1x12x81xf32> to vector<12x81xf32>
    %cst_52 = arith.constant dense<0.000000e+00> : vector<12x289xf32>
    %88 = tpu.matmul %87, %6, %cst_52 {dimension_numbers = #tpu.dot_dimension_numbers<[1], [0], [0], [1], [0, 0, 1, 1], [], []>} : vector<12x81xf32>, vector<81x289xf32>, vector<12x289xf32> -> vector<12x289xf32>
    %cst_53 = arith.constant 6.000000e+00 : f32
    %89 = vector.broadcast %cst_53 : f32 to vector<1x289xf32>
    %90 = arith.subf %5, %89 : vector<1x289xf32>
    %91 = math.absf %90 : vector<1x289xf32>
    %cst_54 = arith.constant 1.000000e+00 : f32
    %92 = vector.broadcast %cst_54 : f32 to vector<1x289xf32>
    %93 = arith.subf %92, %91 : vector<1x289xf32>
    %cst_55 = arith.constant 0.000000e+00 : f32
    %94 = vector.broadcast %cst_55 : f32 to vector<1x289xf32>
    %95 = arith.maximumf %94, %93 : vector<1x289xf32>
    %96 = vector.broadcast %95 : vector<1x289xf32> to vector<12x289xf32>
    %97 = arith.mulf %96, %88 : vector<12x289xf32>
    %98 = arith.addf %85, %97 : vector<12x289xf32>
    %c0_56 = arith.constant 0 : index
    %c7 = arith.constant 7 : index
    %c0_57 = arith.constant 0 : index
    %c0_58 = arith.constant 0 : index
    %99 = vector.load %arg1[%c0_56, %c7, %c0_57, %c0_58] : memref<1x8x12x81xf32, #tpu.memory_space<vmem>>, vector<1x1x12x81xf32>
    %100 = vector.shape_cast %99 : vector<1x1x12x81xf32> to vector<12x81xf32>
    %cst_59 = arith.constant dense<0.000000e+00> : vector<12x289xf32>
    %101 = tpu.matmul %100, %6, %cst_59 {dimension_numbers = #tpu.dot_dimension_numbers<[1], [0], [0], [1], [0, 0, 1, 1], [], []>} : vector<12x81xf32>, vector<81x289xf32>, vector<12x289xf32> -> vector<12x289xf32>
    %cst_60 = arith.constant 7.000000e+00 : f32
    %102 = vector.broadcast %cst_60 : f32 to vector<1x289xf32>
    %103 = arith.subf %5, %102 : vector<1x289xf32>
    %104 = math.absf %103 : vector<1x289xf32>
    %cst_61 = arith.constant 1.000000e+00 : f32
    %105 = vector.broadcast %cst_61 : f32 to vector<1x289xf32>
    %106 = arith.subf %105, %104 : vector<1x289xf32>
    %cst_62 = arith.constant 0.000000e+00 : f32
    %107 = vector.broadcast %cst_62 : f32 to vector<1x289xf32>
    %108 = arith.maximumf %107, %106 : vector<1x289xf32>
    %109 = vector.broadcast %108 : vector<1x289xf32> to vector<12x289xf32>
    %110 = arith.mulf %109, %101 : vector<12x289xf32>
    %111 = arith.addf %98, %110 : vector<12x289xf32>
    %c0_63 = arith.constant 0 : index
    %c0_64 = arith.constant 0 : index
    %c0_65 = arith.constant 0 : index
    %112 = vector.load %arg4[%c0_63, %c0_64, %c0_65] : memref<1x12x289xf32, #tpu.memory_space<vmem>>, vector<1x12x289xf32>
    %113 = vector.shape_cast %112 : vector<1x12x289xf32> to vector<12x289xf32>
    %114 = vector.shape_cast %111 : vector<12x289xf32> to vector<1x12x289xf32>
    tpu.vector_store %arg4[%c0_63, %c0_64, %c0_65], %114 {strides = array<i32>} : memref<1x12x289xf32, #tpu.memory_space<vmem>>, vector<1x12x289xf32>,
    return
  }
  func.func @transform_0(%arg0: i32) -> (i32, i32, i32, i32) {
    %c0_i32 = arith.constant 0 : i32
    %c0_i32_0 = arith.constant 0 : i32
    %c0_i32_1 = arith.constant 0 : i32
    %c0_i32_2 = arith.constant 0 : i32
    return %arg0, %c0_i32, %c0_i32_0, %c0_i32_1 : i32, i32, i32, i32
  }
  func.func @transform_1(%arg0: i32) -> (i32, i32) {
    %c0_i32 = arith.constant 0 : i32
    %c0_i32_0 = arith.constant 0 : i32
    %c0_i32_1 = arith.constant 0 : i32
    return %c0_i32, %c0_i32_0 : i32, i32
  }
  func.func @transform_2(%arg0: i32) -> (i32, i32, i32) {
    %c0_i32 = arith.constant 0 : i32
    %c0_i32_0 = arith.constant 0 : i32
    %c0_i32_1 = arith.constant 0 : i32
    return %arg0, %c0_i32, %c0_i32_0 : i32, i32, i32
  }
  func.func @transform_3(%arg0: i32) -> (i32, i32, i32) {
    %c0_i32 = arith.constant 0 : i32
    %c0_i32_0 = arith.constant 0 : i32
    %c0_i32_1 = arith.constant 0 : i32
    return %arg0, %c0_i32, %c0_i32_0 : i32, i32, i32
  }
}

</mosaic_0001>

<bundles_post_ra>
// kernel: tpu_custom_call.1
= control target key start
LH: loop header
LB: loop body
LE: loop exit
PB: predicated region body
PF: predicated region fallthrough
CT: control target
= control target key end

     0   :  { %s1258_s12 = smov 0   ;;  %s1961_s0 = inlined_call_operand.vmem [shape: f32[2,8,12,81], index: 0, kind: input, shape index: {}]   ;;  %s1962_s1 = inlined_call_operand.vmem [shape: f32[81,289], index: 1, kind: input, shape index: {}]   ;;  %s1963_s2 = inlined_call_operand.vmem [shape: f32[2,1,289], index: 2, kind: input, shape index: {}]   ;;  %s1964_s3 = inlined_call_operand.vmem [shape: f32[2,12,289], index: 3, kind: output, shape index: {}]  }
   0x1 LB: > { %s1116_s13 = sadd.s32 4294967295, %s1236_s12   ;;  %p1120_p0 = scmp.ge.s32.totalorder %s1236_s12, 1  ;;  %s1236_s12 = sphi %s1258_s12, %s13_s12  }
   0x2   : > { %p146_p1 = scmp.lt.s32.totalorder %s1236_s12, 3 }
   0x4   : > { %p147_p2 = pnand %p1120_p0, %p146_p1 }
   0x5   : > { %p1411_p3 = scmp.lt.s32.totalorder (!%p147_p2), %s1116_s13, 1 }
   0x6   : > { %150 = sbr.rel (%p147_p2) target bundleno = 311 (0x137), region = 32 }
   0xb   : > { %v1269_v0 = vld [vmem:[%s1962_s1 + $0xf0] sm:$0x1]  ;;  %vm233_vm0 = vcmask 1040384   ;;  %v1274_v1 = vld [vmem:[%s1962_s1 + $0xf8] sm:$0x1]  ;;  %v1293_v4 = vld [vmem:[%s1962_s1 + $0xe0] sm:$0xff] }
   0xc   : > { %v1279_v2 = vld [vmem:[%s1962_s1 + $0xd8] sm:$0xff]  ;;  %1124 = vmatpush.msk.msra.mxu0 %vm233_vm0, %v1269_v0  ;;  %1127 = vmatpush.msk.msra.mxu1 %vm233_vm0, %v1274_v1  ;;  %v1288_v3 = vld [vmem:[%s1962_s1 + $0x100] sm:$0x1]  ;;  %v1298_v5 = vld [vmem:[%s1962_s1 + $0xe8] sm:$0xff]  ;;  %s1967_s13 = smov (!%p1411_p3, %s1116_s13), 1  ;;  %vm226_vm1 = vcmask 662528  }
   0xd   : > { %1130 = vmatpush.msk.msra.mxu2 %vm233_vm0, %v1288_v3  ;;  %1135 = vmatpush.msk.msra.mxu3 %vm233_vm0, %v1269_v0  ;;  %v1307_v6 = vld [vmem:[%s1962_s1 + $0xc0] sm:$0xff]  ;;  %v1312_v7 = vld [vmem:[%s1962_s1 + $0xc8] sm:$0xff]  ;;  %v1319_v8 = vld [vmem:[%s1962_s1 + $0xd0] sm:$0xff]  ;;  %s1219_s4 = sshll.u32 %s1967_s13, 7  ;;  %s1220_s8 = smul.u32 3, %s1967_s13  ;;  %vm1043_vm2 = vcmask 269312  }
   0xe   : > { %249 = vmatpush.msra.mxu0 %v1279_v2  ;;  %272 = vmatpush.msra.mxu1 %v1293_v4  ;;  %v1326_v9 = vld [vmem:[%s1962_s1 + $0xa8] sm:$0xff]  ;;  %v1331_v10 = vld [vmem:[%s1962_s1 + $0xb0] sm:$0xff]  ;;  %v1338_v11 = vld [vmem:[%s1962_s1 + $0xb8] sm:$0xff]  ;;  %s1499_s7 = scalar_lea.vmem %s1961_s0, %s1219_s4  ;;  %s1221_s14 = smul.u32 48, %s1967_s13  ;;  %vm1047_vm3 = vcmask 265216  }
   0xf   : > { %295 = vmatpush.msra.mxu2 %v1298_v5  ;;  %349 = vmatpush.msra.mxu3 %v1279_v2  ;;  %v1345_v12 = vld [vmem:[%s1962_s1 + $0x90] sm:$0xff]  ;;  %v1350_v13 = vld [vmem:[%s1962_s1 + $0x98] sm:$0xff]  ;;  %v1357_v14 = vld [vmem:[%s1962_s1 + $0xa0] sm:$0xff]  ;;  %s182_s11 = scalar_lea.vmem %s1963_s2, %s1220_s8 }
  0x10   : > { %250 = vmatpush.msra.mxu0 %v1307_v6  ;;  %273 = vmatpush.msra.mxu1 %v1312_v7  ;;  %v1364_v15 = vld [vmem:[%s1962_s1 + $0x78] sm:$0xff]  ;;  %v1369_v16 = vld [vmem:[%s1962_s1 + $0x80] sm:$0xff]  ;;  %v1376_v17 = vld [vmem:[%s1962_s1 + $0x88] sm:$0xff]  ;;  %s1941_s16 = scalar_lea.vmem %s1964_s3, %s1221_s14 }
  0x11   : > { %296 = vmatpush.msra.mxu2 %v1319_v8  ;;  %350 = vmatpush.msra.mxu3 %v1307_v6  ;;  %v1383_v18 = vld [vmem:[%s1962_s1 + $0x60] sm:$0xff]  ;;  %v1388_v19 = vld [vmem:[%s1962_s1 + $0x68] sm:$0xff]  ;;  %v1395_v20 = vld [vmem:[%s1962_s1 + $0x70] sm:$0xff] }
  0x12   : > { %251 = vmatpush.msra.mxu0 %v1326_v9  ;;  %274 = vmatpush.msra.mxu1 %v1331_v10  ;;  %v1402_v21 = vld [vmem:[%s1962_s1 + $0x48] sm:$0xff]  ;;  %v1407_v22 = vld [vmem:[%s1962_s1 + $0x50] sm:$0xff]  ;;  %v1420_v23 = vld [vmem:[%s1962_s1 + $0x58] sm:$0xff] }
  0x13   : > { %297 = vmatpush.msra.mxu2 %v1338_v11  ;;  %351 = vmatpush.msra.mxu3 %v1326_v9  ;;  %v1427_v24 = vld [vmem:[%s1962_s1 + $0x30] sm:$0xff]  ;;  %v1432_v25 = vld [vmem:[%s1962_s1 + $0x38] sm:$0xff]  ;;  %v1439_v26 = vld [vmem:[%s1962_s1 + $0x40] sm:$0xff] }
  0x14   : > { %252 = vmatpush.msra.mxu0 %v1345_v12  ;;  %275 = vmatpush.msra.mxu1 %v1350_v13  ;;  %v1446_v27 = vld [vmem:[%s1962_s1 + $0x18] sm:$0xff]  ;;  %v1451_v28 = vld [vmem:[%s1962_s1 + $0x20] sm:$0xff]  ;;  %v1464_v29 = vld [vmem:[%s1962_s1 + $0x28] sm:$0xff] }
  0x15   : > { %298 = vmatpush.msra.mxu2 %v1357_v14  ;;  %352 = vmatpush.msra.mxu3 %v1345_v12  ;;  %v1471_v30 = vld [vmem:[%s1962_s1] sm:$0xff]  ;;  %v1476_v31 = vld [vmem:[%s1962_s1 + $0x8] sm:$0xff]  ;;  %v1483_v32 = vld [vmem:[%s1962_s1 + $0x10] sm:$0xff] }
  0x16   : > { %253 = vmatpush.msra.mxu0 %v1364_v15  ;;  %276 = vmatpush.msra.mxu1 %v1369_v16  ;;  %v224_v33 = vld [vmem:[%s1499_s7] sm:$0xff]  ;;  %v1133_v34 = vld [vmem:[%s1499_s7 + $0x10] sm:$0xff]  ;;  %v225_v35 = vld [vmem:[%s1499_s7 + $0x8] sm:$0xf] }
  0x17   : > { %299 = vmatpush.msra.mxu2 %v1376_v17  ;;  %353 = vmatpush.msra.mxu3 %v1364_v15  ;;  %v1134_v36 = vld [vmem:[%s1499_s7 + $0x18] sm:$0xf]  ;;  %v1145_v37 = vld [vmem:[%s1499_s7 + $0x20] sm:$0xff]  ;;  %v1146_v38 = vld [vmem:[%s1499_s7 + $0x28] sm:$0xf] }
  0x18   : > { %254 = vmatpush.msra.mxu0 %v1383_v18  ;;  %277 = vmatpush.msra.mxu1 %v1388_v19  ;;  %v1157_v39 = vld [vmem:[%s1499_s7 + $0x30] sm:$0xff]  ;;  %v1158_v40 = vld [vmem:[%s1499_s7 + $0x38] sm:$0xf]  ;;  %v1169_v41 = vld [vmem:[%s1499_s7 + $0x40] sm:$0xff] }
  0x19   : > { %300 = vmatpush.msra.mxu2 %v1395_v20  ;;  %354 = vmatpush.msra.mxu3 %v1383_v18  ;;  %v1181_v42 = vld [vmem:[%s1499_s7 + $0x50] sm:$0xff]  ;;  %v1170_v43 = vld [vmem:[%s1499_s7 + $0x48] sm:$0xf]  ;;  %v1182_v44 = vld [vmem:[%s1499_s7 + $0x58] sm:$0xf] }
  0x1a   : > { %255 = vmatpush.msra.mxu0 %v1402_v21  ;;  %278 = vmatpush.msra.mxu1 %v1407_v22  ;;  %v1193_v45 = vld [vmem:[%s1499_s7 + $0x60] sm:$0xff]  ;;  %v1194_v46 = vld [vmem:[%s1499_s7 + $0x68] sm:$0xf]  ;;  %v1205_v47 = vld [vmem:[%s1499_s7 + $0x70] sm:$0xff] }
  0x1b   : > { %301 = vmatpush.msra.mxu2 %v1420_v23  ;;  %355 = vmatpush.msra.mxu3 %v1402_v21  ;;  %v1206_v48 = vld [vmem:[%s1499_s7 + $0x78] sm:$0xf] }
  0x1c   : > { %256 = vmatpush.msra.mxu0 %v1427_v24  ;;  %279 = vmatpush.msra.mxu1 %v1432_v25 }
  0x1d   : > { %302 = vmatpush.msra.mxu2 %v1439_v26  ;;  %356 = vmatpush.msra.mxu3 %v1427_v24 }
  0x1e   : > { %257 = vmatpush.msra.mxu0 %v1446_v27  ;;  %280 = vmatpush.msra.mxu1 %v1451_v28 }
  0x1f   : > { %303 = vmatpush.msra.mxu2 %v1464_v29  ;;  %357 = vmatpush.msra.mxu3 %v1446_v27 }
  0x20   : > { %258 = vmatpush.msra.mxu0 %v1471_v30  ;;  %281 = vmatpush.msra.mxu1 %v1476_v31 }
  0x21   : > { %304 = vmatpush.msra.mxu2 %v1483_v32  ;;  %358 = vmatpush.msra.mxu3 %v1471_v30 }
  0x22   : > { %1138 = vmatpush.msk.msrb.mxu0 %vm233_vm0, %v1274_v1  ;;  %1141 = vmatpush.msk.msrb.mxu1 %vm233_vm0, %v1288_v3 }
  0x23   : > { %1147 = vmatpush.msk.msrb.mxu2 %vm233_vm0, %v1269_v0  ;;  %1150 = vmatpush.msk.msrb.mxu3 %vm233_vm0, %v1274_v1 }
  0x24   : > { %372 = vmatpush.msrb.mxu0 %v1293_v4  ;;  %395 = vmatpush.msrb.mxu1 %v1298_v5 }
  0x25   : > { %450 = vmatpush.msrb.mxu2 %v1279_v2  ;;  %473 = vmatpush.msrb.mxu3 %v1293_v4 }
  0x26   : > { %373 = vmatpush.msrb.mxu0 %v1312_v7  ;;  %396 = vmatpush.msrb.mxu1 %v1319_v8 }
  0x27   : > { %451 = vmatpush.msrb.mxu2 %v1307_v6  ;;  %474 = vmatpush.msrb.mxu3 %v1312_v7 }
  0x28   : > { %1131 = vmatmul.msk.f32.vlgmr.msra.gmra.mxu2 %vm226_vm1, %v224_v33  ;;  %374 = vmatpush.msrb.mxu0 %v1331_v10 }
  0x29   : > { %397 = vmatpush.msrb.mxu1 %v1338_v11  ;;  %452 = vmatpush.msrb.mxu2 %v1326_v9 }
  0x2a   : > { %475 = vmatpush.msrb.mxu3 %v1331_v10  ;;  %375 = vmatpush.msrb.mxu0 %v1350_v13 }
  0x2b   : > { %1136 = vmatmul.msk.f32.vlgmr.msra.gmra.mxu3 %vm226_vm1, %v1133_v34  ;;  %398 = vmatpush.msrb.mxu1 %v1357_v14 }
  0x2c   : > { %453 = vmatpush.msrb.mxu2 %v1345_v12  ;;  %476 = vmatpush.msrb.mxu3 %v1350_v13 }
  0x2d   : > { %1125 = vmatmul.msk.f32.vlgmr.msra.gmra.mxu0 %vm226_vm1, %v224_v33  ;;  %1128 = vmatmul.msk.f32.vlgmr.msra.gmra.mxu1 %vm226_vm1, %v224_v33 }
  0x2e   : > { %376 = vmatpush.msrb.mxu0 %v1369_v16  ;;  %399 = vmatpush.msrb.mxu1 %v1376_v17 }
  0x2f   : > { %454 = vmatpush.msrb.mxu2 %v1364_v15  ;;  %477 = vmatpush.msrb.mxu3 %v1369_v16 }
  0x30   : > { %377 = vmatpush.msrb.mxu0 %v1388_v19  ;;  %400 = vmatpush.msrb.mxu1 %v1395_v20 }
  0x31   : > { %455 = vmatpush.msrb.mxu2 %v1383_v18  ;;  %478 = vmatpush.msrb.mxu3 %v1388_v19 }
  0x32   : > { %1132 = vmatmul.msk.f32.gmra.mxu2 %vm226_vm1, %v225_v35  ;;  %378 = vmatpush.msrb.mxu0 %v1407_v22 }
  0x33   : > { %401 = vmatpush.msrb.mxu1 %v1420_v23  ;;  %456 = vmatpush.msrb.mxu2 %v1402_v21 }
  0x34   : > { %479 = vmatpush.msrb.mxu3 %v1407_v22  ;;  %379 = vmatpush.msrb.mxu0 %v1432_v25 }
  0x35   : > { %1137 = vmatmul.msk.f32.gmra.mxu3 %vm226_vm1, %v1134_v36  ;;  %402 = vmatpush.msrb.mxu1 %v1439_v26 }
  0x36   : > { %457 = vmatpush.msrb.mxu2 %v1427_v24  ;;  %480 = vmatpush.msrb.mxu3 %v1432_v25 }
  0x37   : > { %1126 = vmatmul.msk.f32.gmra.mxu0 %vm226_vm1, %v225_v35  ;;  %1129 = vmatmul.msk.f32.gmra.mxu1 %vm226_vm1, %v225_v35 }
  0x38   : > { %380 = vmatpush.msrb.mxu0 %v1451_v28  ;;  %403 = vmatpush.msrb.mxu1 %v1464_v29 }
  0x39   : > { %458 = vmatpush.msrb.mxu2 %v1446_v27  ;;  %481 = vmatpush.msrb.mxu3 %v1451_v28 }
  0x3a   : > { %381 = vmatpush.msrb.mxu0 %v1476_v31  ;;  %404 = vmatpush.msrb.mxu1 %v1483_v32 }
  0x3b   : > { %459 = vmatpush.msrb.mxu2 %v1471_v30  ;;  %482 = vmatpush.msrb.mxu3 %v1476_v31 }
  0x3c   : > { %1148 = vmatmul.msk.f32.vlgmr.msrb.gmra.mxu2 %vm226_vm1, %v1145_v37  ;;  %1153 = vmatpush.msk.msra.mxu0 %vm233_vm0, %v1288_v3 }
  0x3d   : > { %1159 = vmatpush.msk.msra.mxu1 %vm233_vm0, %v1269_v0  ;;  %1162 = vmatpush.msk.msra.mxu2 %vm233_vm0, %v1274_v1 }
  0x3e   : > { %1165 = vmatpush.msk.msra.mxu3 %vm233_vm0, %v1288_v3  ;;  %496 = vmatpush.msra.mxu0 %v1298_v5 }
  0x3f   : > { %1151 = vmatmul.msk.f32.vlgmr.msrb.gmra.mxu3 %vm226_vm1, %v1145_v37  ;;  %551 = vmatpush.msra.mxu1 %v1279_v2 }
  0x40   : > { %574 = vmatpush.msra.mxu2 %v1293_v4  ;;  %597 = vmatpush.msra.mxu3 %v1298_v5 }
  0x41   : > { %497 = vmatpush.msra.mxu0 %v1319_v8  ;;  %552 = vmatpush.msra.mxu1 %v1307_v6 }
  0x42   : > { %575 = vmatpush.msra.mxu2 %v1312_v7  ;;  %598 = vmatpush.msra.mxu3 %v1319_v8 }
  0x43   : > { %1139 = vmatmul.msk.f32.vlgmr.msrb.gmra.mxu0 %vm226_vm1, %v1133_v34  ;;  %1142 = vmatmul.msk.f32.vlgmr.msrb.gmra.mxu1 %vm226_vm1, %v1133_v34 }
  0x44   : > { %498 = vmatpush.msra.mxu0 %v1338_v11  ;;  %553 = vmatpush.msra.mxu1 %v1326_v9 }
  0x45   : > { %576 = vmatpush.msra.mxu2 %v1331_v10  ;;  %599 = vmatpush.msra.mxu3 %v1338_v11 }
  0x46   : > { %499 = vmatpush.msra.mxu0 %v1357_v14  ;;  %554 = vmatpush.msra.mxu1 %v1345_v12 }
  0x47   : > { %577 = vmatpush.msra.mxu2 %v1350_v13  ;;  %600 = vmatpush.msra.mxu3 %v1357_v14 }
  0x48   : > { %500 = vmatpush.msra.mxu0 %v1376_v17  ;;  %555 = vmatpush.msra.mxu1 %v1364_v15 }
  0x49   : > { %578 = vmatpush.msra.mxu2 %v1369_v16  ;;  %601 = vmatpush.msra.mxu3 %v1376_v17 }
  0x4a   : > { %1149 = vmatmul.msk.f32.gmra.mxu2 %vm226_vm1, %v1146_v38  ;;  %501 = vmatpush.msra.mxu0 %v1395_v20 }
  0x4b   : > { %556 = vmatpush.msra.mxu1 %v1383_v18  ;;  %579 = vmatpush.msra.mxu2 %v1388_v19 }
  0x4c   : > { %602 = vmatpush.msra.mxu3 %v1395_v20  ;;  %1140 = vmatmul.msk.f32.gmra.mxu0 %vm226_vm1, %v1134_v36 }
  0x4d   : > { %1143 = vmatmul.msk.f32.gmra.mxu1 %vm226_vm1, %v1134_v36  ;;  %1152 = vmatmul.msk.f32.gmra.mxu3 %vm226_vm1, %v1146_v38 }
  0x4e   : > { %502 = vmatpush.msra.mxu0 %v1420_v23  ;;  %557 = vmatpush.msra.mxu1 %v1402_v21 }
  0x4f   : > { %580 = vmatpush.msra.mxu2 %v1407_v22  ;;  %603 = vmatpush.msra.mxu3 %v1420_v23 }
  0x50   : > { %503 = vmatpush.msra.mxu0 %v1439_v26  ;;  %558 = vmatpush.msra.mxu1 %v1427_v24 }
  0x51   : > { %581 = vmatpush.msra.mxu2 %v1432_v25  ;;  %604 = vmatpush.msra.mxu3 %v1439_v26 }
  0x52   : > { %504 = vmatpush.msra.mxu0 %v1464_v29  ;;  %559 = vmatpush.msra.mxu1 %v1446_v27 }
  0x53   : > { %582 = vmatpush.msra.mxu2 %v1451_v28  ;;  %605 = vmatpush.msra.mxu3 %v1464_v29 }
  0x54   : > { %505 = vmatpush.msra.mxu0 %v1483_v32  ;;  %560 = vmatpush.msra.mxu1 %v1471_v30 }
  0x55   : > { %583 = vmatpush.msra.mxu2 %v1476_v31  ;;  %606 = vmatpush.msra.mxu3 %v1483_v32 }
  0x56   : > { %1154 = vmatmul.msk.f32.vlgmr.msra.gmra.mxu0 %vm226_vm1, %v1145_v37  ;;  %1160 = vmatmul.msk.f32.vlgmr.msra.gmra.mxu1 %vm226_vm1, %v1157_v39 }
  0x57   : > { %1163 = vmatmul.msk.f32.vlgmr.msra.gmra.mxu2 %vm226_vm1, %v1157_v39  ;;  %1166 = vmatmul.msk.f32.vlgmr.msra.gmra.mxu3 %vm226_vm1, %v1157_v39 }
  0x58   : > { %1171 = vmatpush.msk.msrb.mxu0 %vm233_vm0, %v1269_v0  ;;  %1174 = vmatpush.msk.msrb.mxu1 %vm233_vm0, %v1274_v1 }
  0x59   : > { %1177 = vmatpush.msk.msrb.mxu2 %vm233_vm0, %v1288_v3  ;;  %1183 = vmatpush.msk.msrb.mxu3 %vm233_vm0, %v1269_v0 }
  0x5a   : > { %652 = vmatpush.msrb.mxu0 %v1279_v2  ;;  %675 = vmatpush.msrb.mxu1 %v1293_v4 }
  0x5b   : > { %698 = vmatpush.msrb.mxu2 %v1298_v5  ;;  %753 = vmatpush.msrb.mxu3 %v1279_v2 }
  0x5c   : > { %653 = vmatpush.msrb.mxu0 %v1307_v6  ;;  %676 = vmatpush.msrb.mxu1 %v1312_v7 }
  0x5d   : > { %699 = vmatpush.msrb.mxu2 %v1319_v8  ;;  %754 = vmatpush.msrb.mxu3 %v1307_v6 }
  0x5e   : > { %654 = vmatpush.msrb.mxu0 %v1326_v9  ;;  %677 = vmatpush.msrb.mxu1 %v1331_v10 }
  0x5f   : > { %700 = vmatpush.msrb.mxu2 %v1338_v11  ;;  %755 = vmatpush.msrb.mxu3 %v1326_v9 }
  0x60   : > { %1155 = vmatmul.msk.f32.gmra.mxu0 %vm226_vm1, %v1146_v38  ;;  %1161 = vmatmul.msk.f32.gmra.mxu1 %vm226_vm1, %v1158_v40 }
  0x61   : > { %1164 = vmatmul.msk.f32.gmra.mxu2 %vm226_vm1, %v1158_v40  ;;  %1167 = vmatmul.msk.f32.gmra.mxu3 %vm226_vm1, %v1158_v40 }
  0x62   : > { %655 = vmatpush.msrb.mxu0 %v1345_v12  ;;  %678 = vmatpush.msrb.mxu1 %v1350_v13 }
  0x63   : > { %701 = vmatpush.msrb.mxu2 %v1357_v14  ;;  %756 = vmatpush.msrb.mxu3 %v1345_v12 }
  0x64   : > { %656 = vmatpush.msrb.mxu0 %v1364_v15  ;;  %679 = vmatpush.msrb.mxu1 %v1369_v16 }
  0x65   : > { %702 = vmatpush.msrb.mxu2 %v1376_v17  ;;  %757 = vmatpush.msrb.mxu3 %v1364_v15 }
  0x66   : > { %657 = vmatpush.msrb.mxu0 %v1383_v18  ;;  %680 = vmatpush.msrb.mxu1 %v1388_v19 }
  0x67   : > { %703 = vmatpush.msrb.mxu2 %v1395_v20  ;;  %758 = vmatpush.msrb.mxu3 %v1383_v18 }
  0x68   : > { %658 = vmatpush.msrb.mxu0 %v1402_v21  ;;  %681 = vmatpush.msrb.mxu1 %v1407_v22 }
  0x69   : > { %704 = vmatpush.msrb.mxu2 %v1420_v23  ;;  %759 = vmatpush.msrb.mxu3 %v1402_v21 }
  0x6a   : > { %659 = vmatpush.msrb.mxu0 %v1427_v24  ;;  %682 = vmatpush.msrb.mxu1 %v1432_v25 }
  0x6b   : > { %705 = vmatpush.msrb.mxu2 %v1439_v26  ;;  %760 = vmatpush.msrb.mxu3 %v1427_v24 }
  0x6c   : > { %660 = vmatpush.msrb.mxu0 %v1446_v27  ;;  %683 = vmatpush.msrb.mxu1 %v1451_v28 }
  0x6d   : > { %706 = vmatpush.msrb.mxu2 %v1464_v29  ;;  %761 = vmatpush.msrb.mxu3 %v1446_v27 }
  0x6e   : > { %661 = vmatpush.msrb.mxu0 %v1471_v30  ;;  %684 = vmatpush.msrb.mxu1 %v1476_v31 }
  0x6f   : > { %707 = vmatpush.msrb.mxu2 %v1483_v32  ;;  %762 = vmatpush.msrb.mxu3 %v1471_v30 }
  0x70   : > { %1172 = vmatmul.msk.f32.vlgmr.msrb.gmra.mxu0 %vm226_vm1, %v1169_v41  ;;  %1175 = vmatmul.msk.f32.vlgmr.msrb.gmra.mxu1 %vm226_vm1, %v1169_v41 }
  0x71   : > { %1178 = vmatmul.msk.f32.vlgmr.msrb.gmra.mxu2 %vm226_vm1, %v1169_v41  ;;  %1184 = vmatmul.msk.f32.vlgmr.msrb.gmra.mxu3 %vm226_vm1, %v1181_v42 }
  0x72   : > { %1186 = vmatpush.msk.msra.mxu0 %vm233_vm0, %v1274_v1  ;;  %1189 = vmatpush.msk.msra.mxu1 %vm233_vm0, %v1288_v3 }
  0x73   : > { %1195 = vmatpush.msk.msra.mxu2 %vm233_vm0, %v1269_v0  ;;  %1198 = vmatpush.msk.msra.mxu3 %vm233_vm0, %v1274_v1 }
  0x74   : > { %776 = vmatpush.msra.mxu0 %v1293_v4  ;;  %799 = vmatpush.msra.mxu1 %v1298_v5 }
  0x75   : > { %854 = vmatpush.msra.mxu2 %v1279_v2  ;;  %877 = vmatpush.msra.mxu3 %v1293_v4 }
  0x76   : > { %777 = vmatpush.msra.mxu0 %v1312_v7  ;;  %800 = vmatpush.msra.mxu1 %v1319_v8 }
  0x77   : > { %855 = vmatpush.msra.mxu2 %v1307_v6  ;;  %878 = vmatpush.msra.mxu3 %v1312_v7 }
  0x78   : > { %778 = vmatpush.msra.mxu0 %v1331_v10  ;;  %801 = vmatpush.msra.mxu1 %v1338_v11 }
  0x79   : > { %856 = vmatpush.msra.mxu2 %v1326_v9  ;;  %879 = vmatpush.msra.mxu3 %v1331_v10 }
  0x7a   : > { %1173 = vmatmul.msk.f32.gmra.mxu0 %vm226_vm1, %v1170_v43  ;;  %1176 = vmatmul.msk.f32.gmra.mxu1 %vm226_vm1, %v1170_v43 }
  0x7b   : > { %1179 = vmatmul.msk.f32.gmra.mxu2 %vm226_vm1, %v1170_v43  ;;  %1185 = vmatmul.msk.f32.gmra.mxu3 %vm226_vm1, %v1182_v44 }
  0x7c   : > { %779 = vmatpush.msra.mxu0 %v1350_v13  ;;  %802 = vmatpush.msra.mxu1 %v1357_v14 }
  0x7d   : > { %857 = vmatpush.msra.mxu2 %v1345_v12  ;;  %880 = vmatpush.msra.mxu3 %v1350_v13 }
  0x7e   : > { %780 = vmatpush.msra.mxu0 %v1369_v16  ;;  %803 = vmatpush.msra.mxu1 %v1376_v17 }
  0x7f   : > { %858 = vmatpush.msra.mxu2 %v1364_v15  ;;  %881 = vmatpush.msra.mxu3 %v1369_v16 }
  0x80   : > { %781 = vmatpush.msra.mxu0 %v1388_v19  ;;  %804 = vmatpush.msra.mxu1 %v1395_v20 }
  0x81   : > { %859 = vmatpush.msra.mxu2 %v1383_v18  ;;  %882 = vmatpush.msra.mxu3 %v1388_v19 }
  0x82   : > { %782 = vmatpush.msra.mxu0 %v1407_v22  ;;  %805 = vmatpush.msra.mxu1 %v1420_v23 }
  0x83   : > { %860 = vmatpush.msra.mxu2 %v1402_v21  ;;  %883 = vmatpush.msra.mxu3 %v1407_v22 }
  0x84   : > { %783 = vmatpush.msra.mxu0 %v1432_v25  ;;  %806 = vmatpush.msra.mxu1 %v1439_v26 }
  0x85   : > { %861 = vmatpush.msra.mxu2 %v1427_v24  ;;  %884 = vmatpush.msra.mxu3 %v1432_v25 }
  0x86   : > { %784 = vmatpush.msra.mxu0 %v1451_v28  ;;  %807 = vmatpush.msra.mxu1 %v1464_v29 }
  0x87   : > { %862 = vmatpush.msra.mxu2 %v1446_v27  ;;  %885 = vmatpush.msra.mxu3 %v1451_v28 }
  0x88   : > { %785 = vmatpush.msra.mxu0 %v1476_v31  ;;  %808 = vmatpush.msra.mxu1 %v1483_v32 }
  0x89   : > { %863 = vmatpush.msra.mxu2 %v1471_v30  ;;  %886 = vmatpush.msra.mxu3 %v1476_v31 }
  0x8a   : > { %1187 = vmatmul.msk.f32.vlgmr.msra.gmra.mxu0 %vm226_vm1, %v1181_v42  ;;  %1190 = vmatmul.msk.f32.vlgmr.msra.gmra.mxu1 %vm226_vm1, %v1181_v42 }
  0x8b   : > { %1196 = vmatmul.msk.f32.vlgmr.msra.gmra.mxu2 %vm226_vm1, %v1193_v45  ;;  %1199 = vmatmul.msk.f32.vlgmr.msra.gmra.mxu3 %vm226_vm1, %v1193_v45 }
  0x8c   : > { %1201 = vmatpush.msk.msrb.mxu0 %vm233_vm0, %v1288_v3  ;;  %1207 = vmatpush.msk.msrb.mxu1 %vm233_vm0, %v1269_v0 }
  0x8d   : > { %1210 = vmatpush.msk.msrb.mxu2 %vm233_vm0, %v1274_v1  ;;  %1213 = vmatpush.msk.msrb.mxu3 %vm233_vm0, %v1288_v3  ;;  %v188_v3 = vld [vmem:[%s182_s11] sm:$0x7] }
  0x8e   : > { %900 = vmatpush.msrb.mxu0 %v1298_v5  ;;  %955 = vmatpush.msrb.mxu1 %v1279_v2 }
  0x8f   : > { %978 = vmatpush.msrb.mxu2 %v1293_v4  ;;  %1001 = vmatpush.msrb.mxu3 %v1298_v5 }
  0x90   : > { %901 = vmatpush.msrb.mxu0 %v1319_v8  ;;  %956 = vmatpush.msrb.mxu1 %v1307_v6  ;;  %v189_v6 = vadd.f32 1.0, %v188_v3 }
  0x91   : > { %979 = vmatpush.msrb.mxu2 %v1312_v7  ;;  %1002 = vmatpush.msrb.mxu3 %v1319_v8 }
  0x92   : > { %902 = vmatpush.msrb.mxu0 %v1338_v11  ;;  %957 = vmatpush.msrb.mxu1 %v1326_v9  ;;  %v190_v9 = vmul.f32 3.5, %v189_v6 }
  0x93   : > { %980 = vmatpush.msrb.mxu2 %v1331_v10  ;;  %1003 = vmatpush.msrb.mxu3 %v1338_v11 }
  0x94   : > { %1188 = vmatmul.msk.f32.gmra.mxu0 %vm226_vm1, %v1182_v44  ;;  %1191 = vmatmul.msk.f32.gmra.mxu1 %vm226_vm1, %v1182_v44  ;;  %v1204_v33 = vadd.f32 -6.0, %v190_v9  ;;  %v1216_v43 = vadd.f32 -7.0, %v190_v9 }
  0x95   : > { %1197 = vmatmul.msk.f32.gmra.mxu2 %vm226_vm1, %v1194_v46  ;;  %1200 = vmatmul.msk.f32.gmra.mxu3 %vm226_vm1, %v1194_v46 }
  0x96   : > { %903 = vmatpush.msrb.mxu0 %v1357_v14  ;;  %958 = vmatpush.msrb.mxu1 %v1345_v12  ;;  %v1144_v12 = vadd.f32 -1.0, %v190_v9  ;;  %v918_v42 = vand.u32 2147483647, %v1204_v33 }
  0x97   : > { %981 = vmatpush.msrb.mxu2 %v1350_v13  ;;  %1004 = vmatpush.msrb.mxu3 %v1357_v14 }
  0x98   : > { %904 = vmatpush.msrb.mxu0 %v1376_v17  ;;  %959 = vmatpush.msrb.mxu1 %v1364_v15  ;;  %v312_v15 = vand.u32 2147483647, %v190_v9 }
  0x99   : > { %982 = vmatpush.msrb.mxu2 %v1369_v16  ;;  %1005 = vmatpush.msrb.mxu3 %v1376_v17  ;;  %v413_v16 = vand.u32 2147483647, %v1144_v12  ;;  %v1156_v17 = vadd.f32 -2.0, %v190_v9 }
  0x9a   : > { %905 = vmatpush.msrb.mxu0 %v1395_v20  ;;  %960 = vmatpush.msrb.mxu1 %v1383_v18  ;;  %v1168_v18 = vadd.f32 -3.0, %v190_v9 }
  0x9b   : > { %983 = vmatpush.msrb.mxu2 %v1388_v19  ;;  %1006 = vmatpush.msrb.mxu3 %v1395_v20 }
  0x9c   : > { %906 = vmatpush.msrb.mxu0 %v1420_v23  ;;  %961 = vmatpush.msrb.mxu1 %v1402_v21  ;;  %v313_v21 = vsub.f32 1.0, %v312_v15 }
  0x9d   : > { %984 = vmatpush.msrb.mxu2 %v1407_v22  ;;  %1007 = vmatpush.msrb.mxu3 %v1420_v23  ;;  %v414_v22 = vsub.f32 1.0, %v413_v16  ;;  %v514_v23 = vand.u32 2147483647, %v1156_v17 }
  0x9e   : > { %907 = vmatpush.msrb.mxu0 %v1439_v26  ;;  %962 = vmatpush.msrb.mxu1 %v1427_v24  ;;  %v1180_v24 = vadd.f32 -4.0, %v190_v9 }
  0x9f   : > { %985 = vmatpush.msrb.mxu2 %v1432_v25  ;;  %1008 = vmatpush.msrb.mxu3 %v1439_v26 }
  0xa0   : > { %908 = vmatpush.msrb.mxu0 %v1464_v29  ;;  %963 = vmatpush.msrb.mxu1 %v1446_v27  ;;  %v615_v27 = vand.u32 2147483647, %v1168_v18  ;;  %v919_v18 = vsub.f32 1.0, %v918_v42 }
  0xa1   : > { %986 = vmatpush.msrb.mxu2 %v1451_v28  ;;  %1009 = vmatpush.msrb.mxu3 %v1464_v29  ;;  %v1192_v28 = vadd.f32 -5.0, %v190_v9  ;;  %v314_v29 = vmax.f32 %v313_v21, 0.0  ;;  %v1019_v9 = vand.u32 2147483647, %v1216_v43 }
  0xa2   : > { %909 = vmatpush.msrb.mxu0 %v1483_v32  ;;  %964 = vmatpush.msrb.mxu1 %v1471_v30  ;;  %v415_v30 = vmax.f32 %v414_v22, 0.0  ;;  %v616_v34 = vsub.f32 1.0, %v615_v27 }
  0xa3   : > { %987 = vmatpush.msrb.mxu2 %v1476_v31  ;;  %1010 = vmatpush.msrb.mxu3 %v1483_v32  ;;  %v515_v31 = vsub.f32 1.0, %v514_v23  ;;  %v716_v32 = vand.u32 2147483647, %v1180_v24  ;;  %v817_v35 = vand.u32 2147483647, %v1192_v28  ;;  %v316_v36 = vperm.slane %v314_v29, 0 }
  0xa4   : > { %1202 = vmatmul.msk.f32.vlgmr.msrb.gmra.mxu0 %vm226_vm1, %v1193_v45  ;;  %1208 = vmatmul.msk.f32.vlgmr.msrb.gmra.mxu1 %vm226_vm1, %v1205_v47  ;;  %v417_v37 = vperm.slane %v415_v30, 0  ;;  %v317_v44 = vperm.slane %v314_v29, 1  ;;  %v418_v45 = vperm.slane %v415_v30, 1  ;;  %v318_v12 = vperm.slane %v314_v29, 2 }
  0xa5   : > { %1211 = vmatmul.msk.f32.vlgmr.msrb.gmra.mxu2 %vm226_vm1, %v1205_v47  ;;  %1214 = vmatmul.msk.f32.vlgmr.msrb.gmra.mxu3 %vm226_vm1, %v1205_v47  ;;  %v1865_v38 = vmax.f32 %v515_v31, 0.0  ;;  %v717_v39 = vsub.f32 1.0, %v716_v32  ;;  %v818_v3 = vsub.f32 1.0, %v817_v35  ;;  %v419_v23 = vperm.slane %v415_v30, 2 }
  0xa7   : > { %v518_v16 = vperm.slane %v1865_v38, 0  ;;  %v1880_v17 = vmax.f32 %v717_v39, 0.0  ;;  %v519_v24 = vperm.slane %v1865_v38, 1 }
  0xa9   : > { %v720_v30 = vperm.slane %v1880_v17, 0 }
  0xaa   : > { %v1801_v49 = vpop.f32.mrf.mxu0  ;;  %v1803_v50 = vpop.f32.mrf.mxu1 }
  0xab   : > { %v1805_v51 = vpop.f32.mrf.mxu2  ;;  %v322_v6 = vmul.f32 %v316_v36, %v1801_v49  ;;  %v323_v21 = vmul.f32 %v317_v44, %v1803_v50  ;;  %v520_v50 = vperm.slane %v1865_v38, 2 }
  0xac   : > { %1203 = vmatmul.msk.f32.gmra.mxu0 %vm226_vm1, %v1194_v46  ;;  %1209 = vmatmul.msk.f32.gmra.mxu1 %vm226_vm1, %v1206_v48  ;;  %v324_v29 = vmul.f32 %v318_v12, %v1805_v51 }
  0xad   : > { %1212 = vmatmul.msk.f32.gmra.mxu2 %vm226_vm1, %v1206_v48  ;;  %1215 = vmatmul.msk.f32.gmra.mxu3 %vm226_vm1, %v1206_v48  ;;  %v1875_v48 = vmax.f32 %v616_v34, 0.0  ;;  %v1895_v34 = vmax.f32 %v919_v18, 0.0 }
  0xae   : > { %v1807_v52 = vpop.f32.mrf.mxu3 }
  0xaf   : > { %v423_v15 = vmul.f32 %v417_v37, %v1807_v52  ;;  %v619_v28 = vperm.slane %v1875_v48, 0  ;;  %v1888_v52 = vmax.f32 %v818_v3, 0.0  ;;  %v621_v3 = vperm.slane %v1875_v48, 2 }
  0xb1   : > { %v429_v31 = vadd.f32 %v423_v15, %v322_v6  ;;  %v821_v39 = vperm.slane %v1888_v52, 0 }
  0xb4   : > { %v1809_v53 = vpop.f32.mrf.mxu0  ;;  %v1811_v54 = vpop.f32.mrf.mxu1 }
  0xb5   : > { %v1813_v55 = vpop.f32.mrf.mxu2  ;;  %v325_v27 = vmul.f32 %v316_v36, %v1809_v53 }
  0xb6   : > { %v327_v35 = vmul.f32 %v318_v12, %v1813_v55 }
  0xb8   : > { %v1815_v56 = vpop.f32.mrf.mxu3 }
  0xb9   : > { %v426_v49 = vmul.f32 %v417_v37, %v1815_v56  ;;  %v1020_v56 = vsub.f32 1.0, %v1019_v9 }
  0xbb   : > { %v1915_v12 = vmax.f32 %v1020_v56, 0.0 }
  0xbf   : > { %v1821_v59 = vpop.f32.mrf.mxu2 }
  0xc0   : > { %v1817_v57 = vpop.f32.mrf.mxu0  ;;  %v1819_v58 = vpop.f32.mrf.mxu1  ;;  %v524_v32 = vmul.f32 %v518_v16, %v1821_v59  ;;  %v432_v59 = vadd.f32 %v426_v49, %v325_v27  ;;  %v1023_v49 = vperm.slane %v1915_v12, 0 }
  0xc1   : > { %v424_v22 = vmul.f32 %v418_v45, %v1817_v57  ;;  %v326_v57 = vmul.f32 %v317_v44, %v1811_v54  ;;  %v425_v51 = vmul.f32 %v419_v23, %v1819_v58  ;;  %v620_v54 = vperm.slane %v1875_v48, 1 }
  0xc2   : > { %v1823_v60 = vpop.f32.mrf.mxu3  ;;  %v530_v42 = vadd.f32 %v524_v32, %v429_v31  ;;  %v722_v48 = vperm.slane %v1880_v17, 2  ;;  %v822_v31 = vperm.slane %v1888_v52, 1 }
  0xc3   : > { %v430_v36 = vadd.f32 %v424_v22, %v323_v21  ;;  %v525_v37 = vmul.f32 %v519_v24, %v1823_v60  ;;  %v431_v15 = vadd.f32 %v425_v51, %v324_v29 }
  0xc5   : > { %v531_v18 = vadd.f32 %v525_v37, %v430_v36  ;;  %v923_v36 = vperm.slane %v1895_v34, 1 }
  0xc9   : > { %v1825_v61 = vpop.f32.mrf.mxu0 }
  0xca   : > { %v1827_v62 = vpop.f32.mrf.mxu1  ;;  %v427_v43 = vmul.f32 %v418_v45, %v1825_v61 }
  0xcb   : > { %v428_v44 = vmul.f32 %v419_v23, %v1827_v62  ;;  %v721_v62 = vperm.slane %v1880_v17, 1  ;;  %v823_v17 = vperm.slane %v1888_v52, 2 }
  0xcc   : > { %v433_v21 = vadd.f32 %v427_v43, %v326_v57 }
  0xcd   : > { %v1829_v63 = vpop.f32.mrf.mxu2 }
  0xce   : > { %v527_v58 = vmul.f32 %v518_v16, %v1829_v63  ;;  %v434_v63 = vadd.f32 %v428_v44, %v327_v35 }
  0xd0   : > { %v1831_v0 = vpop.f32.mrf.mxu3  ;;  %v533_v22 = vadd.f32 %v527_v58, %v432_v59 }
  0xd3   : > { %v1834_v1 = vpop.f32.mrf.mxu0  ;;  %v1836_v2 = vpop.f32.mrf.mxu1 }
  0xd4   : > { %v625_v38 = vmul.f32 %v619_v28, %v1836_v2  ;;  %v922_v2 = vperm.slane %v1895_v34, 0  ;;  %v526_v61 = vmul.f32 %v520_v50, %v1834_v1 }
  0xd6   : > { %v631_v45 = vadd.f32 %v625_v38, %v530_v42  ;;  %v532_v1 = vadd.f32 %v526_v61, %v431_v15 }
  0xda   : > { %v1841_v4 = vpop.f32.mrf.mxu2  ;;  %v1843_v5 = vpop.f32.mrf.mxu3 }
  0xdb   : > { %v627_v16 = vmul.f32 %v621_v3, %v1843_v5 }
  0xdd   : > { %v1845_v7 = vpop.f32.mrf.mxu0  ;;  %v1847_v8 = vpop.f32.mrf.mxu1  ;;  %v633_v35 = vadd.f32 %v627_v16, %v532_v1 }
  0xde   : > { %v628_v29 = vmul.f32 %v619_v28, %v1847_v8  ;;  %v924_v8 = vperm.slane %v1895_v34, 2  ;;  %v529_v52 = vmul.f32 %v520_v50, %v1845_v7 }
  0xe0   : > { %v535_v58 = vadd.f32 %v529_v52, %v434_v63 }
  0xe4   : > { %v1849_v10 = vpop.f32.mrf.mxu2  ;;  %v1851_v11 = vpop.f32.mrf.mxu3 }
  0xed   : > { %v1853_v13 = vpop.f32.mrf.mxu0  ;;  %v1855_v14 = vpop.f32.mrf.mxu1 }
  0xee   : > { %v726_v60 = vmul.f32 %v720_v30, %v1853_v13  ;;  %v626_v13 = vmul.f32 %v620_v54, %v1841_v4  ;;  %v727_v32 = vmul.f32 %v721_v62, %v1855_v14  ;;  %v634_v14 = vadd.f32 %v628_v29, %v533_v22 }
  0xf0   : > { %v732_v23 = vadd.f32 %v726_v60, %v631_v45 }
  0xf4   : > { %v1857_v19 = vpop.f32.mrf.mxu2  ;;  %v1859_v20 = vpop.f32.mrf.mxu3 }
  0xf5   : > { %v827_v9 = vmul.f32 %v821_v39, %v1859_v20  ;;  %v528_v20 = vmul.f32 %v519_v24, %v1831_v0  ;;  %v728_v4 = vmul.f32 %v722_v48, %v1857_v19  ;;  %v629_v19 = vmul.f32 %v620_v54, %v1849_v10 }
  0xf6   : > { %v1024_v10 = vperm.slane %v1915_v12, 1 }
  0xf7   : > { %v1861_v25 = vpop.f32.mrf.mxu0  ;;  %v1863_v26 = vpop.f32.mrf.mxu1  ;;  %v833_v5 = vadd.f32 %v827_v9, %v732_v23  ;;  %v734_v42 = vadd.f32 %v728_v4, %v633_v35  ;;  %v534_v54 = vadd.f32 %v528_v20, %v433_v21 }
  0xf8   : > { %v729_v37 = vmul.f32 %v720_v30, %v1861_v25 }
  0xfa   : > { %v735_v43 = vadd.f32 %v729_v37, %v634_v14 }
  0xfe   : > { %v1867_v40 = vpop.f32.mrf.mxu2  ;;  %v1869_v41 = vpop.f32.mrf.mxu3 }
  0xff   : > { %v830_v7 = vmul.f32 %v821_v39, %v1869_v41  ;;  %v730_v41 = vmul.f32 %v721_v62, %v1863_v26  ;;  %v731_v39 = vmul.f32 %v722_v48, %v1867_v40 }
 0x107   : > { %v1871_v46 = vpop.f32.mrf.mxu0  ;;  %v1873_v47 = vpop.f32.mrf.mxu1 }
 0x108   : > { %v828_v59 = vmul.f32 %v822_v31, %v1871_v46  ;;  %v829_v38 = vmul.f32 %v823_v17, %v1873_v47  ;;  %v1025_v46 = vperm.slane %v1915_v12, 2  ;;  %v630_v47 = vmul.f32 %v621_v3, %v1851_v11 }
 0x10a   : > { %v835_v15 = vadd.f32 %v829_v38, %v734_v42  ;;  %v636_v3 = vadd.f32 %v630_v47, %v535_v58 }
 0x10e   : > { %v865_v33 = vpop.f32.mrf.mxu2  ;;  %v1897_v53 = vpop.f32.mrf.mxu3 }
 0x10f   : > { %v928_v27 = vmul.f32 %v922_v2, %v865_v33  ;;  %v632_v33 = vadd.f32 %v626_v13, %v531_v18  ;;  %v929_v50 = vmul.f32 %v923_v36, %v1897_v53  ;;  %v635_v18 = vadd.f32 %v629_v19, %v534_v54 }
 0x110   : > { %v836_v53 = vadd.f32 %v830_v7, %v735_v43 }
 0x111   : > { %v1908_v55 = vpop.f32.mrf.mxu0  ;;  %v1910_v6 = vpop.f32.mrf.mxu1  ;;  %v934_v0 = vadd.f32 %v928_v27, %v833_v5  ;;  %v733_v34 = vadd.f32 %v727_v32, %v632_v33  ;;  %v736_v23 = vadd.f32 %v730_v41, %v635_v18  ;;  %v737_v27 = vadd.f32 %v731_v39, %v636_v3 }
 0x112   : > { %v831_v26 = vmul.f32 %v822_v31, %v1908_v55  ;;  %v832_v40 = vmul.f32 %v823_v17, %v1910_v6 }
 0x113   : > { %v834_v60 = vadd.f32 %v828_v59, %v733_v34 }
 0x114   : > { %v837_v20 = vadd.f32 %v831_v26, %v736_v23  ;;  %v838_v32 = vadd.f32 %v832_v40, %v737_v27 }
 0x115   : > { %v935_v9 = vadd.f32 %v929_v50, %v834_v60 }
 0x118   : > { %v868_v57 = vpop.f32.mrf.mxu2  ;;  %v891_v56 = vpop.f32.mrf.mxu3 }
 0x119   : > { %v931_v44 = vmul.f32 %v922_v2, %v868_v57  ;;  %v932_v1 = vmul.f32 %v923_v36, %v891_v56 }
 0x11b   : > { %v937_v2 = vadd.f32 %v931_v44, %v836_v53  ;;  %v938_v5 = vadd.f32 %v932_v1, %v837_v20 }
 0x121   : > { %v911_v51 = vpop.f32.mrf.mxu0  ;;  %v966_v28 = vpop.f32.mrf.mxu1 }
 0x122   : > { %v1029_v24 = vmul.f32 %v1023_v49, %v966_v28  ;;  %v930_v30 = vmul.f32 %v924_v8, %v911_v51 }
 0x124   : > { %v1035_v25 = vadd.f32 %v1029_v24, %v934_v0  ;;  %v936_v13 = vadd.f32 %v930_v30, %v835_v15 }
 0x126   : > { %1041 = vst [vmem:[%s1941_s16] sm:$0xff] %v1035_v25 }
 0x128   : > { %v989_v61 = vpop.f32.mrf.mxu2  ;;  %v1012_v45 = vpop.f32.mrf.mxu3 }
 0x129   : > { %v1030_v12 = vmul.f32 %v1024_v10, %v989_v61  ;;  %v1031_v21 = vmul.f32 %v1025_v46, %v1012_v45  ;;  %v969_v11 = vpop.f32.mrf.mxu1  ;;  %v914_v63 = vpop.f32.mrf.mxu0 }
 0x12a   : > { %v1032_v16 = vmul.f32 %v1023_v49, %v969_v11  ;;  %v933_v29 = vmul.f32 %v924_v8, %v914_v63 }
 0x12b   : > { %v1036_v62 = vadd.f32 %v1030_v12, %v935_v9  ;;  %v1037_v48 = vadd.f32 %v1031_v21, %v936_v13 }
 0x12c   : > { %v1038_v22 = vadd.f32 %v1032_v16, %v937_v2  ;;  %v939_v55 = vadd.f32 %v933_v29, %v838_v32 }
 0x12d   : > { %1042 = vst [vmem:[%s1941_s16 + $0x8] sm:$0xff] %v1036_v62 }
 0x12e   : > { %1044 = vst.msk [vmem:[%s1941_s16 + $0x10] sm:$0xff] %vm1043_vm2, %v1037_v48 }
 0x12f   : > { %1045 = vst [vmem:[%s1941_s16 + $0x18] sm:$0xf] %v1038_v22 }
 0x130   : > { %v992_v4 = vpop.f32.mrf.mxu2  ;;  %v1015_v49 = vpop.f32.mrf.mxu3 }
 0x131   : > { %v1033_v31 = vmul.f32 %v1024_v10, %v992_v4  ;;  %v1034_v6 = vmul.f32 %v1025_v46, %v1015_v49 }
 0x133   : > { %v1039_v17 = vadd.f32 %v1033_v31, %v938_v5  ;;  %v1040_v57 = vadd.f32 %v1034_v6, %v939_v55 }
 0x135   : > { %1046 = vst [vmem:[%s1941_s16 + $0x20] sm:$0xf] %v1039_v17 }
 0x136   : > { %1048 = vst.msk [vmem:[%s1941_s16 + $0x28] sm:$0xf] %vm1047_vm3, %v1040_v57 }
 0x137 PF: > { %s13_s12 = sadd.s32 1, %s1236_s12  }
 0x138   : > { %p10_p4 = scmp.ge.s32.totalorder %s13_s12, 4  }
 0x13a   :  { %12 = sbr.rel (!%p10_p4) target bundleno = 1 (0x1), region = 72 }

</bundles_post_ra>
